<compile_context>
chip_gen: v6e
topology: v6e:2x2x1
jax: 0.10.0
libtpu: 0.0.40
codegen_flags: <defaults>
</compile_context>

<pallas_src>
import functools

import jax
import jax.numpy as jnp
from jax.experimental import pallas as pl
from jax.experimental.pallas import tpu as pltpu

N_IN = 2
N_HIDDEN = 10
LANES = 128
SUBLANES = 8
ROW_UNIT = SUBLANES * LANES  # 1024 rows = one full (8, 128) f32 vreg of batch


def _cdiv(a, b):
    return -(-a // b)


def _choose_tiles(batch, tb_max):
    """Pick (tile_rows, padded_rows, steps) for the 1-D batch grid.

    * each tile is a multiple of 1024 rows (full sublane x lane vregs)
    * tiles are capped at tb_max (VMEM: ~24 bytes/row double-buffered)
    * >=2 grid steps whenever the batch spans >=2 units (v7x megacore)
    * tile count is balanced so padding waste stays < one 1024-row unit/step
    """
    tb_max = max(ROW_UNIT, (tb_max // ROW_UNIT) * ROW_UNIT)
    units = _cdiv(max(batch, 1), ROW_UNIT)        # 1024-row units of work
    steps = _cdiv(units * ROW_UNIT, tb_max)       # keep each tile <= tb_max
    if units >= 2:
        steps = max(steps, 2)                     # feed both v7x TensorCores
    units_per_step = _cdiv(units, steps)          # balance -> minimal padding
    tb = units_per_step * ROW_UNIT
    steps = _cdiv(units, units_per_step)
    return tb, steps * tb, steps


def _net_kernel(x_ref, w1_ref, b1_ref, w2_ref, b2_ref, o_ref):
    # x_ref : (2, TBr, 128) VMEM  -- feature-major, batch lane-dense
    # w1_ref: (20,) SMEM  flattened fc1.weight (row-major: [j,0], [j,1])
    # b1_ref: (10,) SMEM  fc1.bias
    # w2_ref: (10,) SMEM  flattened fc2.weight
    # b2_ref: (1,)  SMEM  fc2.bias
    # o_ref : (TBr, 128) VMEM
    x0 = x_ref[0]                      # (TBr, 128)
    x1 = x_ref[1]                      # (TBr, 128)

    # Two accumulators (acc0 seeded directly with the fc2 bias) break the
    # serial add dependence through a single acc; merged once at the end.
    acc0 = jnp.full_like(x0, b2_ref[0])
    acc1 = jnp.zeros_like(x0)
    for j in range(N_HIDDEN):
        # fc1 row j + relu: lane-dense VPU work, SMEM scalars as operands.
        h = x0 * w1_ref[2 * j] + x1 * w1_ref[2 * j + 1] + b1_ref[j]
        h = jnp.maximum(h, 0.0)
        # fc2 contribution of hidden unit j
        if j % 2 == 0:
            acc0 = acc0 + h * w2_ref[j]
        else:
            acc1 = acc1 + h * w2_ref[j]
    z = acc0 + acc1

    # sigmoid(z) == 0.5*tanh(z/2) + 0.5: tanh goes to the EUP slot instead of
    # burning saturated-VALU ops on an exact 1/(1+exp(-z)) divide.
    o_ref[...] = (0.5 * jnp.tanh(0.5 * z) + 0.5).astype(o_ref.dtype)


@functools.partial(jax.jit, static_argnames=("block_batch",))
def net_forward(x, w1, b1, w2, b2, *, block_batch=262144):
    """Forward pass of Net.

    x : (B, 2) float array
    w1: (10, 2) fc1.weight (PyTorch layout), b1: (10,) fc1.bias
    w2: (1, 10) fc2.weight (PyTorch layout), b2: (1,)  fc2.bias
    returns (B, 1) float32
    """
    B = x.shape[0]
    TB, Bp, steps = _choose_tiles(B, block_batch)
    TBr = TB // LANES

    # (B, 2) -> (2, Bp) feature-major repack (single copy fusion under jit),
    # then a free reshape to (2, Bp//128, 128): batch on the lane axis.
    xt = jnp.transpose(x.astype(jnp.float32))
    if Bp != B:
        xt = jnp.pad(xt, ((0, 0), (0, Bp - B)))
    xt = xt.reshape(N_IN, Bp // LANES, LANES)

    # Flatten the tiny params for scalar SMEM access inside the kernel.
    w1f = jnp.asarray(w1, jnp.float32).reshape(-1)   # (20,)
    b1f = jnp.asarray(b1, jnp.float32).reshape(-1)   # (10,)
    w2f = jnp.asarray(w2, jnp.float32).reshape(-1)   # (10,)
    b2f = jnp.asarray(b2, jnp.float32).reshape(-1)   # (1,)

    smem = pl.BlockSpec(memory_space=pltpu.MemorySpace.SMEM)

    out = pl.pallas_call(
        _net_kernel,
        out_shape=jax.ShapeDtypeStruct((Bp // LANES, LANES), jnp.float32),
        grid=(steps,),
        in_specs=[
            pl.BlockSpec((N_IN, TBr, LANES), lambda i: (0, i, 0)),  # x tiles
            smem,   # w1 (resident in SMEM for the whole grid)
            smem,   # b1
            smem,   # w2
            smem,   # b2
        ],
        out_specs=pl.BlockSpec((TBr, LANES), lambda i: (i, 0)),
        compiler_params=pltpu.CompilerParams(
            dimension_semantics=("parallel",),
        ),
    )(xt, w1f, b1f, w2f, b2f)

    # Undo the lane-dense packing / padding.
    return out.reshape(Bp)[:B].reshape(B, 1)


def _reference(x, w1, b1, w2, b2):
    """Plain-JAX reference, identical math to the PyTorch module."""
    h = jnp.maximum(x @ w1.T + b1, 0.0)
    return 1.0 / (1.0 + jnp.exp(-(h @ w2.T + b2)))


if __name__ == "__main__":
    key = jax.random.PRNGKey(0)
    k_x, k_x2, k1, k2, k3, k4 = jax.random.split(key, 6)

    # PyTorch-layout parameters.
    w1 = jax.random.uniform(k1, (N_HIDDEN, N_IN), jnp.float32, -0.5, 0.5)
    b1 = jax.random.uniform(k2, (N_HIDDEN,), jnp.float32, -0.5, 0.5)
    w2 = jax.random.uniform(k3, (1, N_HIDDEN), jnp.float32, -0.5, 0.5)
    b2 = jax.random.uniform(k4, (1,), jnp.float32, -0.5, 0.5)

    # Small batch (single grid step, padded to one 1024-row tile).
    B = 8
    x = jax.random.normal(k_x, (B, N_IN), jnp.float32)
    out = jax.block_until_ready(net_forward(x, w1, b1, w2, b2))
    ref = _reference(x, w1, b1, w2, b2)
    assert out.shape == (B, 1)
    assert jnp.allclose(out, ref, atol=1e-5, rtol=1e-5)

    # Non-aligned batch exercising the multi-step (>=2) grid + padding path.
    B2 = 4100
    x2 = jax.random.normal(k_x2, (B2, N_IN), jnp.float32)
    out2 = jax.block_until_ready(net_forward(x2, w1, b1, w2, b2))
    ref2 = _reference(x2, w1, b1, w2, b2)
    assert out2.shape == (B2, 1)
    assert jnp.allclose(out2, ref2, atol=1e-5, rtol=1e-5)

    print("KERNEL_OK")
</pallas_src>

<mosaic_0001>
module attributes {stable_mosaic.version = 11 : i64} {
  func.func @_net_kernel(%arg0: i32, %arg1: memref<2x8x128xf32, #tpu.memory_space<vmem>>, %arg2: memref<20xf32, #tpu.memory_space<smem>>, %arg3: memref<10xf32, #tpu.memory_space<smem>>, %arg4: memref<10xf32, #tpu.memory_space<smem>>, %arg5: memref<1xf32, #tpu.memory_space<smem>>, %arg6: memref<8x128xf32, #tpu.memory_space<vmem>>) attributes {dimension_semantics = [#tpu.dimension_semantics<parallel>], iteration_bounds = array<i64: 1>, scalar_prefetch = 0 : i64, scratch_operands = 0 : i64, tpu.core_type = #tpu.core_type<tc>, window_params = [{transform_indices = @transform_0, window_bounds = array<i64: 2, 8, 128>}, {transform_indices = @transform_1, window_bounds = array<i64: 20>}, {transform_indices = @transform_2, window_bounds = array<i64: 10>}, {transform_indices = @transform_3, window_bounds = array<i64: 10>}, {transform_indices = @transform_4, window_bounds = array<i64: 1>}, {transform_indices = @transform_5, window_bounds = array<i64: 8, 128>}]} {
    %c0 = arith.constant 0 : index
    %c0_0 = arith.constant 0 : index
    %c0_1 = arith.constant 0 : index
    %0 = vector.load %arg1[%c0, %c0_0, %c0_1] : memref<2x8x128xf32, #tpu.memory_space<vmem>>, vector<1x8x128xf32>
    %1 = vector.shape_cast %0 : vector<1x8x128xf32> to vector<8x128xf32>
    %c1 = arith.constant 1 : index
    %c0_2 = arith.constant 0 : index
    %c0_3 = arith.constant 0 : index
    %2 = vector.load %arg1[%c1, %c0_2, %c0_3] : memref<2x8x128xf32, #tpu.memory_space<vmem>>, vector<1x8x128xf32>
    %3 = vector.shape_cast %2 : vector<1x8x128xf32> to vector<8x128xf32>
    %c0_4 = arith.constant 0 : index
    %4 = memref.load %arg5[%c0_4] : memref<1xf32, #tpu.memory_space<smem>>
    %5 = vector.broadcast %4 : f32 to vector<8x128xf32>
    %cst = arith.constant 0.000000e+00 : f32
    %6 = vector.broadcast %cst : f32 to vector<8x128xf32>
    %c0_5 = arith.constant 0 : index
    %7 = memref.load %arg2[%c0_5] : memref<20xf32, #tpu.memory_space<smem>>
    %8 = vector.broadcast %7 : f32 to vector<8x128xf32>
    %9 = arith.mulf %1, %8 : vector<8x128xf32>
    %c1_6 = arith.constant 1 : index
    %10 = memref.load %arg2[%c1_6] : memref<20xf32, #tpu.memory_space<smem>>
    %11 = vector.broadcast %10 : f32 to vector<8x128xf32>
    %12 = arith.mulf %3, %11 : vector<8x128xf32>
    %13 = arith.addf %9, %12 : vector<8x128xf32>
    %c0_7 = arith.constant 0 : index
    %14 = memref.load %arg3[%c0_7] : memref<10xf32, #tpu.memory_space<smem>>
    %15 = vector.broadcast %14 : f32 to vector<8x128xf32>
    %16 = arith.addf %13, %15 : vector<8x128xf32>
    %cst_8 = arith.constant 0.000000e+00 : f32
    %17 = vector.broadcast %cst_8 : f32 to vector<8x128xf32>
    %18 = arith.maximumf %16, %17 : vector<8x128xf32>
    %c0_9 = arith.constant 0 : index
    %19 = memref.load %arg4[%c0_9] : memref<10xf32, #tpu.memory_space<smem>>
    %20 = vector.broadcast %19 : f32 to vector<8x128xf32>
    %21 = arith.mulf %18, %20 : vector<8x128xf32>
    %22 = arith.addf %5, %21 : vector<8x128xf32>
    %c2 = arith.constant 2 : index
    %23 = memref.load %arg2[%c2] : memref<20xf32, #tpu.memory_space<smem>>
    %24 = vector.broadcast %23 : f32 to vector<8x128xf32>
    %25 = arith.mulf %1, %24 : vector<8x128xf32>
    %c3 = arith.constant 3 : index
    %26 = memref.load %arg2[%c3] : memref<20xf32, #tpu.memory_space<smem>>
    %27 = vector.broadcast %26 : f32 to vector<8x128xf32>
    %28 = arith.mulf %3, %27 : vector<8x128xf32>
    %29 = arith.addf %25, %28 : vector<8x128xf32>
    %c1_10 = arith.constant 1 : index
    %30 = memref.load %arg3[%c1_10] : memref<10xf32, #tpu.memory_space<smem>>
    %31 = vector.broadcast %30 : f32 to vector<8x128xf32>
    %32 = arith.addf %29, %31 : vector<8x128xf32>
    %cst_11 = arith.constant 0.000000e+00 : f32
    %33 = vector.broadcast %cst_11 : f32 to vector<8x128xf32>
    %34 = arith.maximumf %32, %33 : vector<8x128xf32>
    %c1_12 = arith.constant 1 : index
    %35 = memref.load %arg4[%c1_12] : memref<10xf32, #tpu.memory_space<smem>>
    %36 = vector.broadcast %35 : f32 to vector<8x128xf32>
    %37 = arith.mulf %34, %36 : vector<8x128xf32>
    %38 = arith.addf %6, %37 : vector<8x128xf32>
    %c4 = arith.constant 4 : index
    %39 = memref.load %arg2[%c4] : memref<20xf32, #tpu.memory_space<smem>>
    %40 = vector.broadcast %39 : f32 to vector<8x128xf32>
    %41 = arith.mulf %1, %40 : vector<8x128xf32>
    %c5 = arith.constant 5 : index
    %42 = memref.load %arg2[%c5] : memref<20xf32, #tpu.memory_space<smem>>
    %43 = vector.broadcast %42 : f32 to vector<8x128xf32>
    %44 = arith.mulf %3, %43 : vector<8x128xf32>
    %45 = arith.addf %41, %44 : vector<8x128xf32>
    %c2_13 = arith.constant 2 : index
    %46 = memref.load %arg3[%c2_13] : memref<10xf32, #tpu.memory_space<smem>>
    %47 = vector.broadcast %46 : f32 to vector<8x128xf32>
    %48 = arith.addf %45, %47 : vector<8x128xf32>
    %cst_14 = arith.constant 0.000000e+00 : f32
    %49 = vector.broadcast %cst_14 : f32 to vector<8x128xf32>
    %50 = arith.maximumf %48, %49 : vector<8x128xf32>
    %c2_15 = arith.constant 2 : index
    %51 = memref.load %arg4[%c2_15] : memref<10xf32, #tpu.memory_space<smem>>
    %52 = vector.broadcast %51 : f32 to vector<8x128xf32>
    %53 = arith.mulf %50, %52 : vector<8x128xf32>
    %54 = arith.addf %22, %53 : vector<8x128xf32>
    %c6 = arith.constant 6 : index
    %55 = memref.load %arg2[%c6] : memref<20xf32, #tpu.memory_space<smem>>
    %56 = vector.broadcast %55 : f32 to vector<8x128xf32>
    %57 = arith.mulf %1, %56 : vector<8x128xf32>
    %c7 = arith.constant 7 : index
    %58 = memref.load %arg2[%c7] : memref<20xf32, #tpu.memory_space<smem>>
    %59 = vector.broadcast %58 : f32 to vector<8x128xf32>
    %60 = arith.mulf %3, %59 : vector<8x128xf32>
    %61 = arith.addf %57, %60 : vector<8x128xf32>
    %c3_16 = arith.constant 3 : index
    %62 = memref.load %arg3[%c3_16] : memref<10xf32, #tpu.memory_space<smem>>
    %63 = vector.broadcast %62 : f32 to vector<8x128xf32>
    %64 = arith.addf %61, %63 : vector<8x128xf32>
    %cst_17 = arith.constant 0.000000e+00 : f32
    %65 = vector.broadcast %cst_17 : f32 to vector<8x128xf32>
    %66 = arith.maximumf %64, %65 : vector<8x128xf32>
    %c3_18 = arith.constant 3 : index
    %67 = memref.load %arg4[%c3_18] : memref<10xf32, #tpu.memory_space<smem>>
    %68 = vector.broadcast %67 : f32 to vector<8x128xf32>
    %69 = arith.mulf %66, %68 : vector<8x128xf32>
    %70 = arith.addf %38, %69 : vector<8x128xf32>
    %c8 = arith.constant 8 : index
    %71 = memref.load %arg2[%c8] : memref<20xf32, #tpu.memory_space<smem>>
    %72 = vector.broadcast %71 : f32 to vector<8x128xf32>
    %73 = arith.mulf %1, %72 : vector<8x128xf32>
    %c9 = arith.constant 9 : index
    %74 = memref.load %arg2[%c9] : memref<20xf32, #tpu.memory_space<smem>>
    %75 = vector.broadcast %74 : f32 to vector<8x128xf32>
    %76 = arith.mulf %3, %75 : vector<8x128xf32>
    %77 = arith.addf %73, %76 : vector<8x128xf32>
    %c4_19 = arith.constant 4 : index
    %78 = memref.load %arg3[%c4_19] : memref<10xf32, #tpu.memory_space<smem>>
    %79 = vector.broadcast %78 : f32 to vector<8x128xf32>
    %80 = arith.addf %77, %79 : vector<8x128xf32>
    %cst_20 = arith.constant 0.000000e+00 : f32
    %81 = vector.broadcast %cst_20 : f32 to vector<8x128xf32>
    %82 = arith.maximumf %80, %81 : vector<8x128xf32>
    %c4_21 = arith.constant 4 : index
    %83 = memref.load %arg4[%c4_21] : memref<10xf32, #tpu.memory_space<smem>>
    %84 = vector.broadcast %83 : f32 to vector<8x128xf32>
    %85 = arith.mulf %82, %84 : vector<8x128xf32>
    %86 = arith.addf %54, %85 : vector<8x128xf32>
    %c10 = arith.constant 10 : index
    %87 = memref.load %arg2[%c10] : memref<20xf32, #tpu.memory_space<smem>>
    %88 = vector.broadcast %87 : f32 to vector<8x128xf32>
    %89 = arith.mulf %1, %88 : vector<8x128xf32>
    %c11 = arith.constant 11 : index
    %90 = memref.load %arg2[%c11] : memref<20xf32, #tpu.memory_space<smem>>
    %91 = vector.broadcast %90 : f32 to vector<8x128xf32>
    %92 = arith.mulf %3, %91 : vector<8x128xf32>
    %93 = arith.addf %89, %92 : vector<8x128xf32>
    %c5_22 = arith.constant 5 : index
    %94 = memref.load %arg3[%c5_22] : memref<10xf32, #tpu.memory_space<smem>>
    %95 = vector.broadcast %94 : f32 to vector<8x128xf32>
    %96 = arith.addf %93, %95 : vector<8x128xf32>
    %cst_23 = arith.constant 0.000000e+00 : f32
    %97 = vector.broadcast %cst_23 : f32 to vector<8x128xf32>
    %98 = arith.maximumf %96, %97 : vector<8x128xf32>
    %c5_24 = arith.constant 5 : index
    %99 = memref.load %arg4[%c5_24] : memref<10xf32, #tpu.memory_space<smem>>
    %100 = vector.broadcast %99 : f32 to vector<8x128xf32>
    %101 = arith.mulf %98, %100 : vector<8x128xf32>
    %102 = arith.addf %70, %101 : vector<8x128xf32>
    %c12 = arith.constant 12 : index
    %103 = memref.load %arg2[%c12] : memref<20xf32, #tpu.memory_space<smem>>
    %104 = vector.broadcast %103 : f32 to vector<8x128xf32>
    %105 = arith.mulf %1, %104 : vector<8x128xf32>
    %c13 = arith.constant 13 : index
    %106 = memref.load %arg2[%c13] : memref<20xf32, #tpu.memory_space<smem>>
    %107 = vector.broadcast %106 : f32 to vector<8x128xf32>
    %108 = arith.mulf %3, %107 : vector<8x128xf32>
    %109 = arith.addf %105, %108 : vector<8x128xf32>
    %c6_25 = arith.constant 6 : index
    %110 = memref.load %arg3[%c6_25] : memref<10xf32, #tpu.memory_space<smem>>
    %111 = vector.broadcast %110 : f32 to vector<8x128xf32>
    %112 = arith.addf %109, %111 : vector<8x128xf32>
    %cst_26 = arith.constant 0.000000e+00 : f32
    %113 = vector.broadcast %cst_26 : f32 to vector<8x128xf32>
    %114 = arith.maximumf %112, %113 : vector<8x128xf32>
    %c6_27 = arith.constant 6 : index
    %115 = memref.load %arg4[%c6_27] : memref<10xf32, #tpu.memory_space<smem>>
    %116 = vector.broadcast %115 : f32 to vector<8x128xf32>
    %117 = arith.mulf %114, %116 : vector<8x128xf32>
    %118 = arith.addf %86, %117 : vector<8x128xf32>
    %c14 = arith.constant 14 : index
    %119 = memref.load %arg2[%c14] : memref<20xf32, #tpu.memory_space<smem>>
    %120 = vector.broadcast %119 : f32 to vector<8x128xf32>
    %121 = arith.mulf %1, %120 : vector<8x128xf32>
    %c15 = arith.constant 15 : index
    %122 = memref.load %arg2[%c15] : memref<20xf32, #tpu.memory_space<smem>>
    %123 = vector.broadcast %122 : f32 to vector<8x128xf32>
    %124 = arith.mulf %3, %123 : vector<8x128xf32>
    %125 = arith.addf %121, %124 : vector<8x128xf32>
    %c7_28 = arith.constant 7 : index
    %126 = memref.load %arg3[%c7_28] : memref<10xf32, #tpu.memory_space<smem>>
    %127 = vector.broadcast %126 : f32 to vector<8x128xf32>
    %128 = arith.addf %125, %127 : vector<8x128xf32>
    %cst_29 = arith.constant 0.000000e+00 : f32
    %129 = vector.broadcast %cst_29 : f32 to vector<8x128xf32>
    %130 = arith.maximumf %128, %129 : vector<8x128xf32>
    %c7_30 = arith.constant 7 : index
    %131 = memref.load %arg4[%c7_30] : memref<10xf32, #tpu.memory_space<smem>>
    %132 = vector.broadcast %131 : f32 to vector<8x128xf32>
    %133 = arith.mulf %130, %132 : vector<8x128xf32>
    %134 = arith.addf %102, %133 : vector<8x128xf32>
    %c16 = arith.constant 16 : index
    %135 = memref.load %arg2[%c16] : memref<20xf32, #tpu.memory_space<smem>>
    %136 = vector.broadcast %135 : f32 to vector<8x128xf32>
    %137 = arith.mulf %1, %136 : vector<8x128xf32>
    %c17 = arith.constant 17 : index
    %138 = memref.load %arg2[%c17] : memref<20xf32, #tpu.memory_space<smem>>
    %139 = vector.broadcast %138 : f32 to vector<8x128xf32>
    %140 = arith.mulf %3, %139 : vector<8x128xf32>
    %141 = arith.addf %137, %140 : vector<8x128xf32>
    %c8_31 = arith.constant 8 : index
    %142 = memref.load %arg3[%c8_31] : memref<10xf32, #tpu.memory_space<smem>>
    %143 = vector.broadcast %142 : f32 to vector<8x128xf32>
    %144 = arith.addf %141, %143 : vector<8x128xf32>
    %cst_32 = arith.constant 0.000000e+00 : f32
    %145 = vector.broadcast %cst_32 : f32 to vector<8x128xf32>
    %146 = arith.maximumf %144, %145 : vector<8x128xf32>
    %c8_33 = arith.constant 8 : index
    %147 = memref.load %arg4[%c8_33] : memref<10xf32, #tpu.memory_space<smem>>
    %148 = vector.broadcast %147 : f32 to vector<8x128xf32>
    %149 = arith.mulf %146, %148 : vector<8x128xf32>
    %150 = arith.addf %118, %149 : vector<8x128xf32>
    %c18 = arith.constant 18 : index
    %151 = memref.load %arg2[%c18] : memref<20xf32, #tpu.memory_space<smem>>
    %152 = vector.broadcast %151 : f32 to vector<8x128xf32>
    %153 = arith.mulf %1, %152 : vector<8x128xf32>
    %c19 = arith.constant 19 : index
    %154 = memref.load %arg2[%c19] : memref<20xf32, #tpu.memory_space<smem>>
    %155 = vector.broadcast %154 : f32 to vector<8x128xf32>
    %156 = arith.mulf %3, %155 : vector<8x128xf32>
    %157 = arith.addf %153, %156 : vector<8x128xf32>
    %c9_34 = arith.constant 9 : index
    %158 = memref.load %arg3[%c9_34] : memref<10xf32, #tpu.memory_space<smem>>
    %159 = vector.broadcast %158 : f32 to vector<8x128xf32>
    %160 = arith.addf %157, %159 : vector<8x128xf32>
    %cst_35 = arith.constant 0.000000e+00 : f32
    %161 = vector.broadcast %cst_35 : f32 to vector<8x128xf32>
    %162 = arith.maximumf %160, %161 : vector<8x128xf32>
    %c9_36 = arith.constant 9 : index
    %163 = memref.load %arg4[%c9_36] : memref<10xf32, #tpu.memory_space<smem>>
    %164 = vector.broadcast %163 : f32 to vector<8x128xf32>
    %165 = arith.mulf %162, %164 : vector<8x128xf32>
    %166 = arith.addf %134, %165 : vector<8x128xf32>
    %167 = arith.addf %150, %166 : vector<8x128xf32>
    %cst_37 = arith.constant 5.000000e-01 : f32
    %168 = vector.broadcast %cst_37 : f32 to vector<8x128xf32>
    %169 = arith.mulf %168, %167 : vector<8x128xf32>
    %170 = math.tanh %169 : vector<8x128xf32>
    %cst_38 = arith.constant 5.000000e-01 : f32
    %171 = vector.broadcast %cst_38 : f32 to vector<8x128xf32>
    %172 = arith.mulf %171, %170 : vector<8x128xf32>
    %cst_39 = arith.constant 5.000000e-01 : f32
    %173 = vector.broadcast %cst_39 : f32 to vector<8x128xf32>
    %174 = arith.addf %172, %173 : vector<8x128xf32>
    %c0_40 = arith.constant 0 : index
    %c0_41 = arith.constant 0 : index
    %175 = vector.load %arg6[%c0_40, %c0_41] : memref<8x128xf32, #tpu.memory_space<vmem>>, vector<8x128xf32>
    tpu.vector_store %arg6[%c0_40, %c0_41], %174 {strides = array<i32>} : memref<8x128xf32, #tpu.memory_space<vmem>>, vector<8x128xf32>,
    return
  }
  func.func @transform_0(%arg0: i32) -> (i32, i32, i32) {
    %c0_i32 = arith.constant 0 : i32
    %c0_i32_0 = arith.constant 0 : i32
    %c0_i32_1 = arith.constant 0 : i32
    return %c0_i32, %arg0, %c0_i32_0 : i32, i32, i32
  }
  func.func @transform_1(%arg0: i32) -> i32 {
    %c0_i32 = arith.constant 0 : i32
    %c0_i32_0 = arith.constant 0 : i32
    return %c0_i32 : i32
  }
  func.func @transform_2(%arg0: i32) -> i32 {
    %c0_i32 = arith.constant 0 : i32
    %c0_i32_0 = arith.constant 0 : i32
    return %c0_i32 : i32
  }
  func.func @transform_3(%arg0: i32) -> i32 {
    %c0_i32 = arith.constant 0 : i32
    %c0_i32_0 = arith.constant 0 : i32
    return %c0_i32 : i32
  }
  func.func @transform_4(%arg0: i32) -> i32 {
    %c0_i32 = arith.constant 0 : i32
    %c0_i32_0 = arith.constant 0 : i32
    return %c0_i32 : i32
  }
  func.func @transform_5(%arg0: i32) -> (i32, i32) {
    %c0_i32 = arith.constant 0 : i32
    %c0_i32_0 = arith.constant 0 : i32
    return %arg0, %c0_i32 : i32, i32
  }
}

</mosaic_0001>

<bundles_post_ra>
// kernel: net_forward.1
= control target key start
LH: loop header
LB: loop body
LE: loop exit
PB: predicated region body
PF: predicated region fallthrough
CT: control target
= control target key end

     0   :  { %11 = vsyncpa [#allocation4], 0  ;;  %s460_s0 = inlined_call_operand.vmem [shape: f32[2,8,128], index: 0, kind: input, shape index: {}]   ;;  %s461_s1 = inlined_call_operand.vmem [shape: f32[20], index: 1, kind: input, shape index: {}]   ;;  %s462_s2 = inlined_call_operand.vmem [shape: f32[10], index: 2, kind: input, shape index: {}]   ;;  %s463_s3 = inlined_call_operand.vmem [shape: f32[10], index: 3, kind: input, shape index: {}]   ;;  %s464_s4 = inlined_call_operand.<no memory space> [shape: f32[1], index: 4, kind: input, shape index: {}]   ;;  %s465_s5 = inlined_call_operand.vmem [shape: f32[8,128], index: 5, kind: output, shape index: {}]  }
   0x1   :  { %12 = vsyncpa [#allocation6], 0  ;;  %s31_s20 = sshll.u32 %s462_s2, 4  ;;  %s21_s23 = sshll.u32 %s461_s1, 4  ;;  %s32_s20 = int_to_ptr.vmem [resolvable:$true] %s31_s20  ;;  %s22_s23 = int_to_ptr.vmem [resolvable:$true] %s21_s23 }
   0x2   :  { %s267_s24 = scalar_lea.vmem %s32_s20, 16  ;;  %p272_p1 = scmp.lt.s32.totalorder %s32_s20, %s32_s20 }
   0x3   :  { %p268_p0 = scmp.ne.s32.totalorder %s32_s20, %s267_s24  ;;  %p273_p2 = scmp.lt.s32.totalorder %s267_s24, %s267_s24 }
   0x5   :  { %p274_p3 = por %p273_p2, %p272_p1 }
   0x7   :  { %p275_p4 = pnand %p274_p3, %p268_p0 }
   0x9   :  { %278 = shalt.err (!%p275_p4)
}
   0xa   :  { %s307_s25 = smov [#allocation5]   ;;  %s279_s26 = scalar_lea.vmem %s22_s23, 16 }
   0xb   :  { %34 = dma.vmem_to_smem %s32_s20, 16, %s307_s25, [#allocation6]  }
   0xc   :  { %p280_p5 = scmp.ne.s32.totalorder %s22_s23, %s279_s26  ;;  %p284_p6 = scmp.lt.s32.totalorder %s22_s23, %s22_s23 }
   0xd   :  { %p285_p7 = scmp.lt.s32.totalorder %s279_s26, %s279_s26 }
   0xf   :  { %p286_p8 = por %p285_p7, %p284_p6 }
  0x11   :  { %p287_p9 = pnand %p286_p8, %p280_p5 }
  0x13   :  { %290 = shalt.err (!%p287_p9)
}
  0x14   :  { %s308_s2 = smov [#allocation3]   ;;  %s41_s28 = sshll.u32 %s463_s3, 4  ;;  %s42_s28 = int_to_ptr.vmem [resolvable:$true] %s41_s28 }
  0x15   :  { %24 = dma.vmem_to_smem %s22_s23, 16, %s308_s2, [#allocation4]  }
  0x16   :  { %s291_s29 = scalar_lea.vmem %s42_s28, 16  ;;  %p296_p11 = scmp.lt.s32.totalorder %s42_s28, %s42_s28 }
  0x17   :  { %p292_p10 = scmp.ne.s32.totalorder %s42_s28, %s291_s29  ;;  %p297_p12 = scmp.lt.s32.totalorder %s291_s29, %s291_s29 }
  0x19   :  { %p298_p13 = por %p297_p12, %p296_p11 }
  0x1b   :  { %p299_p0 = pnand %p298_p13, %p292_p10 }
  0x1d   :  { %302 = shalt.err (!%p299_p0)
}
  0x1e   :  { %s309_s30 = smov [#allocation7]  }
  0x1f   :  { %44 = dma.vmem_to_smem %s42_s28, 16, %s309_s30, [#allocation6]  }
  0x20   :  { %303 = dma.done.wait [#allocation4], 16  }
  0x21   :  { %304 = vsyncadd [#allocation4], 4294967280 }
  0x22   :  { %305 = dma.done.wait [#allocation6], 32  }
  0x23   :  { %306 = vsyncadd [#allocation6], 4294967264 }
  0x24   :  { %56 = sfence }
  0x25   :  { %s62_s6 = sld [smem:[#allocation3]]  ;;  %v366_v0 = vld [vmem:[%s460_s0] sm:$0xff]  ;;  %v371_v1 = vld [vmem:[%s460_s0 + $0x8] sm:$0xff]  ;;  %v61_v49 = vstv %s464_s4 }
  0x26   :  { %s225_s7 = sld [smem:[#allocation3 + $0x1]] }
  0x27   :  { %s349_s8 = sld [smem:[#allocation5]] }
  0x28   :  { %s351_s3 = sld [smem:[#allocation7]] }
  0x29   :  { %s353_s9 = sld [smem:[#allocation3 + $0x2]] }
  0x2a   :  { %s355_s10 = sld [smem:[#allocation3 + $0x3]] }
  0x2b   :  { %s357_s11 = sld [smem:[#allocation5 + $0x1]]  ;;  %v63_v2 = vstv %s62_s6 }
  0x2c   :  { %s359_s12 = sld [smem:[#allocation7 + $0x1]]  ;;  %v66_v3 = vstv %s225_s7  ;;  %v64_v4 = vmul.f32 %v63_v2, %v366_v0 }
  0x2d   :  { %s230_s13 = sld [smem:[#allocation3 + $0x4]]  ;;  %v67_v5 = vmul.f32 %v371_v1, %v66_v3  ;;  %v70_v12 = vstv %s349_s8 }
  0x2e   :  { %s231_s14 = sld [smem:[#allocation3 + $0x5]]  ;;  %v74_v33 = vstv %s351_s3 }
  0x2f   :  { %s361_s15 = sld [smem:[#allocation5 + $0x2]]  ;;  %v68_v8 = vadd.f32 %v67_v5, %v64_v4  ;;  %v78_v9 = vstv %s353_s9 }
  0x30   :  { %s373_s20 = sld [smem:[#allocation7 + $0x2]]  ;;  %v81_v10 = vstv %s355_s10  ;;  %v79_v16 = vmul.f32 %v78_v9, %v366_v0 }
  0x31   :  { %s234_s21 = sld [smem:[#allocation3 + $0x6]]  ;;  %v82_v17 = vmul.f32 %v371_v1, %v81_v10  ;;  %v71_v20 = vadd.f32 %v70_v12, %v68_v8  ;;  %v85_v30 = vstv %s357_s11 }
  0x32   :  { %s235_s22 = sld [smem:[#allocation3 + $0x7]]  ;;  %v89_v54 = vstv %s359_s12 }
  0x33   :  { %s377_s23 = sld [smem:[#allocation5 + $0x3]]  ;;  %v93_v6 = vstv %s230_s13  ;;  %v83_v27 = vadd.f32 %v82_v17, %v79_v16  ;;  %v72_v29 = vmax.f32 %v71_v20, 0.0 }
  0x34   :  { %s379_s24 = sld [smem:[#allocation7 + $0x3]]  ;;  %v96_v7 = vstv %s231_s14  ;;  %v94_v13 = vmul.f32 %v93_v6, %v366_v0 }
  0x35   :  { %s238_s0 = sld [smem:[#allocation3 + $0x8]]  ;;  %v97_v14 = vmul.f32 %v371_v1, %v96_v7  ;;  %v100_v24 = vstv %s361_s15  ;;  %v86_v39 = vadd.f32 %v85_v30, %v83_v27  ;;  %v75_v42 = vmul.f32 %v74_v33, %v72_v29 }
  0x36   :  { %s239_s25 = sld [smem:[#allocation3 + $0x9]]  ;;  %v104_v50 = vstv %s373_s20 }
  0x37   :  { %v108_v11 = vstv %s234_s21  ;;  %s383_s26 = sld [smem:[#allocation5 + $0x4]]  ;;  %v98_v22 = vadd.f32 %v97_v14, %v94_v13  ;;  %v87_v53 = vmax.f32 %v86_v39, 0.0  ;;  %v76_v61 = vadd.f32 %v75_v42, %v61_v49 }
  0x38   :  { %v111_v15 = vstv %s235_s22  ;;  %s388_s2 = sld [smem:[#allocation7 + $0x4]]  ;;  %v109_v18 = vmul.f32 %v108_v11, %v366_v0 }
  0x39   :  { %s242_s1 = sld [smem:[#allocation3 + $0xa]]  ;;  %v112_v19 = vmul.f32 %v371_v1, %v111_v15  ;;  %v115_v31 = vstv %s377_s23  ;;  %v101_v34 = vadd.f32 %v100_v24, %v98_v22  ;;  %v90_v6 = vmul.f32 %v89_v54, %v87_v53 }
  0x3a   :  { %s243_s27 = sld [smem:[#allocation3 + $0xb]]  ;;  %v119_v57 = vstv %s379_s24 }
  0x3b   :  { %v123_v21 = vstv %s238_s0  ;;  %s394_s28 = sld [smem:[#allocation5 + $0x5]]  ;;  %v113_v28 = vadd.f32 %v112_v19, %v109_v18  ;;  %v102_v45 = vmax.f32 %v101_v34, 0.0 }
  0x3c   :  { %v126_v23 = vstv %s239_s25  ;;  %s396_s29 = sld [smem:[#allocation7 + $0x5]]  ;;  %v124_v25 = vmul.f32 %v123_v21, %v366_v0 }
  0x3d   :  { %v127_v26 = vmul.f32 %v371_v1, %v126_v23  ;;  %s246_s30 = sld [smem:[#allocation3 + $0xc]]  ;;  %v116_v40 = vadd.f32 %v115_v31, %v113_v28  ;;  %v130_v41 = vstv %s383_s26  ;;  %v105_v62 = vmul.f32 %v104_v50, %v102_v45 }
  0x3e   :  { %s247_s6 = sld [smem:[#allocation3 + $0xd]]  ;;  %v134_v8 = vstv %s388_s2 }
  0x3f   :  { %v138_v32 = vstv %s242_s1  ;;  %s403_s7 = sld [smem:[#allocation5 + $0x6]]  ;;  %v128_v37 = vadd.f32 %v127_v26, %v124_v25  ;;  %v117_v55 = vmax.f32 %v116_v40, 0.0  ;;  %v106_v13 = vadd.f32 %v105_v62, %v76_v61 }
  0x40   :  { %v139_v35 = vmul.f32 %v138_v32, %v366_v0  ;;  %v141_v36 = vstv %s243_s27  ;;  %s407_s8 = sld [smem:[#allocation7 + $0x6]] }
  0x41   :  { %v142_v38 = vmul.f32 %v371_v1, %v141_v36  ;;  %s410_s9 = sld [smem:[#allocation3 + $0xe]]  ;;  %v145_v46 = vstv %s394_s28  ;;  %v131_v51 = vadd.f32 %v130_v41, %v128_v37  ;;  %v120_v7 = vmul.f32 %v119_v57, %v117_v55 }
  0x42   :  { %s413_s10 = sld [smem:[#allocation3 + $0xf]]  ;;  %v149_v14 = vstv %s396_s29 }
  0x43   :  { %v143_v43 = vadd.f32 %v142_v38, %v139_v35  ;;  %v153_v44 = vstv %s246_s30  ;;  %s415_s3 = sld [smem:[#allocation5 + $0x7]]  ;;  %v132_v3 = vmax.f32 %v131_v51, 0.0  ;;  %v121_v21 = vadd.f32 %v120_v7, %v90_v6 }
  0x44   :  { %v154_v47 = vmul.f32 %v153_v44, %v366_v0  ;;  %v156_v48 = vstv %s247_s6  ;;  %s419_s11 = sld [smem:[#allocation7 + $0x7]] }
  0x45   :  { %v157_v52 = vmul.f32 %v371_v1, %v156_v48  ;;  %s426_s15 = sld [smem:[#allocation3 + $0x10]]  ;;  %v160_v56 = vstv %s403_s7  ;;  %v146_v58 = vadd.f32 %v145_v46, %v143_v43  ;;  %v135_v17 = vmul.f32 %v134_v8, %v132_v3 }
  0x46   :  { %s430_s16 = sld [smem:[#allocation3 + $0x11]]  ;;  %v164_v22 = vstv %s407_s8 }
  0x47   :  { %v158_v59 = vadd.f32 %v157_v52, %v154_v47  ;;  %v168_v60 = vstv %s410_s9  ;;  %s434_s4 = sld [smem:[#allocation5 + $0x8]]  ;;  %v147_v10 = vmax.f32 %v146_v58, 0.0  ;;  %v136_v31 = vadd.f32 %v135_v17, %v106_v13 }
  0x48   :  { %v169_v63 = vmul.f32 %v168_v60, %v366_v0  ;;  %v171_v2 = vstv %s413_s10  ;;  %s438_s12 = sld [smem:[#allocation7 + $0x8]] }
  0x49   :  { %v161_v4 = vadd.f32 %v160_v56, %v158_v59  ;;  %v172_v5 = vmul.f32 %v371_v1, %v171_v2  ;;  %s258_s17 = sld [smem:[#allocation3 + $0x12]]  ;;  %v175_v9 = vstv %s415_s3  ;;  %v150_v24 = vmul.f32 %v149_v14, %v147_v10 }
  0x4a   :  { %s259_s18 = sld [smem:[#allocation3 + $0x13]]  ;;  %v179_v28 = vstv %s419_s11 }
  0x4b   :  { %v173_v11 = vadd.f32 %v172_v5, %v169_v63  ;;  %v183_v12 = vstv %s426_s15  ;;  %s444_s19 = sld [smem:[#allocation5 + $0x9]]  ;;  %v162_v18 = vmax.f32 %v161_v4, 0.0  ;;  %v151_v37 = vadd.f32 %v150_v24, %v121_v21 }
  0x4c   :  { %v184_v15 = vmul.f32 %v183_v12, %v366_v0  ;;  %v186_v16 = vstv %s430_s16  ;;  %s261_s20 = sld [smem:[#allocation7 + $0x9]] }
  0x4d   :  { %v176_v19 = vadd.f32 %v175_v9, %v173_v11  ;;  %v187_v20 = vmul.f32 %v371_v1, %v186_v16  ;;  %v190_v23 = vstv %s434_s4  ;;  %v165_v32 = vmul.f32 %v164_v22, %v162_v18 }
  0x4e   :  { %v194_v35 = vstv %s438_s12 }
  0x4f   :  { %v177_v25 = vmax.f32 %v176_v19, 0.0  ;;  %v188_v26 = vadd.f32 %v187_v20, %v184_v15  ;;  %v198_v27 = vstv %s258_s17  ;;  %v166_v41 = vadd.f32 %v165_v32, %v136_v31 }
  0x50   :  { %v199_v29 = vmul.f32 %v198_v27, %v366_v0  ;;  %v201_v30 = vstv %s259_s18 }
  0x51   :  { %v191_v33 = vadd.f32 %v190_v23, %v188_v26  ;;  %v202_v34 = vmul.f32 %v371_v1, %v201_v30  ;;  %v205_v36 = vstv %s444_s19  ;;  %v180_v38 = vmul.f32 %v179_v28, %v177_v25 }
  0x52   :  { %v209_v44 = vstv %s261_s20 }
  0x53   :  { %v192_v39 = vmax.f32 %v191_v33, 0.0  ;;  %v203_v40 = vadd.f32 %v202_v34, %v199_v29  ;;  %v181_v45 = vadd.f32 %v180_v38, %v151_v37 }
  0x55   :  { %v195_v42 = vmul.f32 %v194_v35, %v192_v39  ;;  %v206_v43 = vadd.f32 %v205_v36, %v203_v40 }
  0x57   :  { %v207_v46 = vmax.f32 %v206_v43, 0.0  ;;  %v196_v47 = vadd.f32 %v195_v42, %v166_v41 }
  0x59   :  { %v210_v0 = vmul.f32 %v209_v44, %v207_v46 }
  0x5b   :  { %v211_v48 = vadd.f32 %v210_v0, %v181_v45 }
  0x5d   :  { %v212_v49 = vadd.f32 %v211_v48, %v196_v47 }
  0x5f   :  { %v213_v50 = vmul.f32 0.5, %v212_v49 }
  0x61   :  { %265 = vtanh.f32 %v213_v50 }
  0x6e   :  { %v266_v51 = vpop.eup %265 }
  0x6f   :  { %v215_v1 = vmul.f32 0.5, %v266_v51 }
  0x71   :  { %v216_v52 = vadd.f32 0.5, %v215_v1 }
  0x73   :  { %217 = vst [vmem:[%s465_s5] sm:$0xff] %v216_v52 }
  0x74   :  { %222 = vsyncpa [#allocation4], 1 }
  0x75   :  { %223 = vsyncpa [#allocation6], 1 }

</bundles_post_ra>
